<compile_context>
chip_gen: v6e
topology: v6e:2x2x1
jax: 0.10.0
libtpu: 0.0.40
codegen_flags: <defaults>
</compile_context>

<pallas_src>
import jax
import jax.numpy as jnp
from jax.experimental import pallas as pl
from jax.experimental.pallas import tpu as pltpu


def mlp_kernel(x_ref, w1c0_ref, w1c1_ref, b1_ref, w2_ref, b2_ref, o_ref):
    # x:    (2, TB)   batch on lanes
    # w1c0: (12, 1)   column 0 of the (12, 2) PyTorch weight
    # w1c1: (12, 1)   column 1
    # b1:   (12, 1)
    # w2:   (12, 1)   column form of the (1, 12) output weight
    # b2:   (1, 1)
    x = x_ref[...]
    x0 = x[0:1, :]                                    # (1, TB)
    x1 = x[1:2, :]                                    # (1, TB)

    # Layer 1 as VPU broadcast FMAs: h[j, b] = w1[j,0]*x0[b] + w1[j,1]*x1[b] + b1[j]
    h = w1c0_ref[...] * x0 + w1c1_ref[...] * x1 + b1_ref[...]   # (12, TB)
    h = jnp.maximum(h, 0.0)                                      # ReLU

    # Layer 2: out[b] = sum_j w2[j] * h[j, b] + b2   (sublane reduce on XLU)
    out = jnp.sum(w2_ref[...] * h, axis=0, keepdims=True) + b2_ref[...]  # (1, TB)
    o_ref[...] = out.astype(o_ref.dtype)


def pythagorean_forward(x, w1, b1, w2, b2, *, max_tb=8192):
    """x: (B, 2); w1: (12, 2); b1: (12,); w2: (1, 12); b2: (1,) -> (B, 1)."""
    B = x.shape[0]

    # Wrapper-side layout plumbing (cheap one-time XLA ops): batch on lanes,
    # weights/biases as column vectors the kernel broadcasts from directly.
    xt = x.T.astype(jnp.float32)                         # (2, B)
    w1f = w1.astype(jnp.float32)
    w1c0 = w1f[:, 0:1]                                   # (12, 1)
    w1c1 = w1f[:, 1:2]                                   # (12, 1)
    b1_col = b1.reshape(-1, 1).astype(jnp.float32)       # (12, 1)
    w2_col = w2.reshape(-1, 1).astype(jnp.float32)       # (12, 1)
    b2_2d = b2.reshape(1, 1).astype(jnp.float32)         # (1, 1)

    # Lane-aligned batch tiling.
    lane = 128
    b_pad = max(lane, pl.cdiv(B, lane) * lane)
    tb = min(max_tb, b_pad)
    b_pad = pl.cdiv(b_pad, tb) * tb                      # multiple of the tile
    if b_pad != B:
        xt = jnp.pad(xt, ((0, 0), (0, b_pad - B)))

    grid = (b_pad // tb,)

    out = pl.pallas_call(
        mlp_kernel,
        out_shape=jax.ShapeDtypeStruct((1, b_pad), jnp.float32),
        grid_spec=pl.GridSpec(
            grid=grid,
            in_specs=[
                pl.BlockSpec((2, tb), lambda i: (0, i)),           # x tile
                pl.BlockSpec(w1c0.shape, lambda i: (0, 0)),        # resident weights
                pl.BlockSpec(w1c1.shape, lambda i: (0, 0)),
                pl.BlockSpec(b1_col.shape, lambda i: (0, 0)),
                pl.BlockSpec(w2_col.shape, lambda i: (0, 0)),
                pl.BlockSpec(b2_2d.shape, lambda i: (0, 0)),
            ],
            out_specs=pl.BlockSpec((1, tb), lambda i: (0, i)),     # lane-dense output
        ),
        compiler_params=pltpu.CompilerParams(
            dimension_semantics=("parallel",),   # lets v7x shard batch over 2 TCs
        ),
    )(xt, w1c0, w1c1, b1_col, w2_col, b2_2d)

    return out[:, :B].T                                  # (B, 1)


def init_params(key):
    # Deterministic init mimicking PyTorch nn.Linear default: U(-1/sqrt(fan_in), 1/sqrt(fan_in))
    k1, k2, k3, k4 = jax.random.split(key, 4)
    lim1 = 1.0 / jnp.sqrt(2.0)
    lim2 = 1.0 / jnp.sqrt(12.0)
    w1 = jax.random.uniform(k1, (12, 2), jnp.float32, -lim1, lim1)
    b1 = jax.random.uniform(k2, (12,), jnp.float32, -lim1, lim1)
    w2 = jax.random.uniform(k3, (1, 12), jnp.float32, -lim2, lim2)
    b2 = jax.random.uniform(k4, (1,), jnp.float32, -lim2, lim2)
    return w1, b1, w2, b2


if __name__ == "__main__":
    key = jax.random.PRNGKey(0)
    k_x, k_p = jax.random.split(key)

    B = 8  # small batch; module's forward takes (batch_size, 2)
    x = jax.random.uniform(k_x, (B, 2), jnp.float32, 0.0, 10.0)
    w1, b1, w2, b2 = init_params(k_p)

    out = pythagorean_forward(x, w1, b1, w2, b2)
    out = jax.block_until_ready(out)

    # Reference check in plain JAX (PyTorch nn.Linear semantics).
    ref = jnp.maximum(x @ w1.T + b1, 0.0) @ w2.T + b2
    assert out.shape == (B, 1)
    assert jnp.allclose(out, ref, atol=1e-5, rtol=1e-5)

    print("KERNEL_OK")
</pallas_src>

<mosaic_0001>
module attributes {stable_mosaic.version = 11 : i64} {
  func.func @mlp_kernel(%arg0: i32, %arg1: memref<2x128xf32, #tpu.memory_space<vmem>>, %arg2: memref<12x1xf32, #tpu.memory_space<vmem>>, %arg3: memref<12x1xf32, #tpu.memory_space<vmem>>, %arg4: memref<12x1xf32, #tpu.memory_space<vmem>>, %arg5: memref<12x1xf32, #tpu.memory_space<vmem>>, %arg6: memref<1x1xf32, #tpu.memory_space<vmem>>, %arg7: memref<1x128xf32, #tpu.memory_space<vmem>>) attributes {dimension_semantics = [#tpu.dimension_semantics<parallel>], iteration_bounds = array<i64: 1>, scalar_prefetch = 0 : i64, scratch_operands = 0 : i64, tpu.core_type = #tpu.core_type<tc>, window_params = [{transform_indices = @transform_0, window_bounds = array<i64: 2, 128>}, {pipeline_mode = #tpu.pipeline_mode<synchronous>, transform_indices = @transform_1, window_bounds = array<i64: 12, 1>}, {pipeline_mode = #tpu.pipeline_mode<synchronous>, transform_indices = @transform_2, window_bounds = array<i64: 12, 1>}, {pipeline_mode = #tpu.pipeline_mode<synchronous>, transform_indices = @transform_3, window_bounds = array<i64: 12, 1>}, {pipeline_mode = #tpu.pipeline_mode<synchronous>, transform_indices = @transform_4, window_bounds = array<i64: 12, 1>}, {pipeline_mode = #tpu.pipeline_mode<synchronous>, transform_indices = @transform_5, window_bounds = array<i64: 1, 1>}, {transform_indices = @transform_6, window_bounds = array<i64: 1, 128>}]} {
    %c0 = arith.constant 0 : index
    %c0_0 = arith.constant 0 : index
    %0 = vector.load %arg1[%c0, %c0_0] : memref<2x128xf32, #tpu.memory_space<vmem>>, vector<2x128xf32>
    %1 = vector.extract_strided_slice %0 {offsets = [0, 0], sizes = [1, 128], strides = [1, 1]} : vector<2x128xf32> to vector<1x128xf32>
    %2 = vector.extract_strided_slice %0 {offsets = [1, 0], sizes = [1, 128], strides = [1, 1]} : vector<2x128xf32> to vector<1x128xf32>
    %c0_1 = arith.constant 0 : index
    %c0_2 = arith.constant 0 : index
    %3 = vector.load %arg2[%c0_1, %c0_2] : memref<12x1xf32, #tpu.memory_space<vmem>>, vector<12x1xf32>
    %4 = vector.broadcast %3 : vector<12x1xf32> to vector<12x128xf32>
    %5 = vector.broadcast %1 : vector<1x128xf32> to vector<12x128xf32>
    %6 = arith.mulf %4, %5 : vector<12x128xf32>
    %c0_3 = arith.constant 0 : index
    %c0_4 = arith.constant 0 : index
    %7 = vector.load %arg3[%c0_3, %c0_4] : memref<12x1xf32, #tpu.memory_space<vmem>>, vector<12x1xf32>
    %8 = vector.broadcast %7 : vector<12x1xf32> to vector<12x128xf32>
    %9 = vector.broadcast %2 : vector<1x128xf32> to vector<12x128xf32>
    %10 = arith.mulf %8, %9 : vector<12x128xf32>
    %11 = arith.addf %6, %10 : vector<12x128xf32>
    %c0_5 = arith.constant 0 : index
    %c0_6 = arith.constant 0 : index
    %12 = vector.load %arg4[%c0_5, %c0_6] : memref<12x1xf32, #tpu.memory_space<vmem>>, vector<12x1xf32>
    %13 = vector.broadcast %12 : vector<12x1xf32> to vector<12x128xf32>
    %14 = arith.addf %11, %13 : vector<12x128xf32>
    %cst = arith.constant 0.000000e+00 : f32
    %15 = vector.broadcast %cst : f32 to vector<12x128xf32>
    %16 = arith.maximumf %14, %15 : vector<12x128xf32>
    %c0_7 = arith.constant 0 : index
    %c0_8 = arith.constant 0 : index
    %17 = vector.load %arg5[%c0_7, %c0_8] : memref<12x1xf32, #tpu.memory_space<vmem>>, vector<12x1xf32>
    %18 = vector.broadcast %17 : vector<12x1xf32> to vector<12x128xf32>
    %19 = arith.mulf %18, %16 : vector<12x128xf32>
    %cst_9 = arith.constant dense<0.000000e+00> : vector<128xf32>
    %20 = vector.multi_reduction <add>, %19, %cst_9 [0] : vector<12x128xf32> to vector<128xf32>
    %21 = vector.shape_cast %20 : vector<128xf32> to vector<1x128xf32>
    %c0_10 = arith.constant 0 : index
    %c0_11 = arith.constant 0 : index
    %22 = vector.load %arg6[%c0_10, %c0_11] : memref<1x1xf32, #tpu.memory_space<vmem>>, vector<1x1xf32>
    %23 = vector.broadcast %22 : vector<1x1xf32> to vector<1x128xf32>
    %24 = arith.addf %21, %23 : vector<1x128xf32>
    %c0_12 = arith.constant 0 : index
    %c0_13 = arith.constant 0 : index
    %25 = vector.load %arg7[%c0_12, %c0_13] : memref<1x128xf32, #tpu.memory_space<vmem>>, vector<1x128xf32>
    tpu.vector_store %arg7[%c0_12, %c0_13], %24 {strides = array<i32>} : memref<1x128xf32, #tpu.memory_space<vmem>>, vector<1x128xf32>,
    return
  }
  func.func @transform_0(%arg0: i32) -> (i32, i32) {
    %c0_i32 = arith.constant 0 : i32
    %c0_i32_0 = arith.constant 0 : i32
    return %c0_i32, %arg0 : i32, i32
  }
  func.func @transform_1(%arg0: i32) -> (i32, i32) {
    %c0_i32 = arith.constant 0 : i32
    %c0_i32_0 = arith.constant 0 : i32
    %c0_i32_1 = arith.constant 0 : i32
    return %c0_i32, %c0_i32_0 : i32, i32
  }
  func.func @transform_2(%arg0: i32) -> (i32, i32) {
    %c0_i32 = arith.constant 0 : i32
    %c0_i32_0 = arith.constant 0 : i32
    %c0_i32_1 = arith.constant 0 : i32
    return %c0_i32, %c0_i32_0 : i32, i32
  }
  func.func @transform_3(%arg0: i32) -> (i32, i32) {
    %c0_i32 = arith.constant 0 : i32
    %c0_i32_0 = arith.constant 0 : i32
    %c0_i32_1 = arith.constant 0 : i32
    return %c0_i32, %c0_i32_0 : i32, i32
  }
  func.func @transform_4(%arg0: i32) -> (i32, i32) {
    %c0_i32 = arith.constant 0 : i32
    %c0_i32_0 = arith.constant 0 : i32
    %c0_i32_1 = arith.constant 0 : i32
    return %c0_i32, %c0_i32_0 : i32, i32
  }
  func.func @transform_5(%arg0: i32) -> (i32, i32) {
    %c0_i32 = arith.constant 0 : i32
    %c0_i32_0 = arith.constant 0 : i32
    %c0_i32_1 = arith.constant 0 : i32
    return %c0_i32, %c0_i32_0 : i32, i32
  }
  func.func @transform_6(%arg0: i32) -> (i32, i32) {
    %c0_i32 = arith.constant 0 : i32
    %c0_i32_0 = arith.constant 0 : i32
    return %c0_i32, %arg0 : i32, i32
  }
}

</mosaic_0001>

<bundles_post_ra>
// kernel: tpu_custom_call.1
= control target key start
LH: loop header
LB: loop body
LE: loop exit
PB: predicated region body
PF: predicated region fallthrough
CT: control target
= control target key end

     0   :  { %s226_s0 = inlined_call_operand.vmem [shape: f32[2,128], index: 0, kind: input, shape index: {}]   ;;  %s227_s1 = inlined_call_operand.vmem [shape: f32[12,1], index: 1, kind: input, shape index: {}]   ;;  %s228_s2 = inlined_call_operand.vmem [shape: f32[12,1], index: 2, kind: input, shape index: {}]   ;;  %s229_s3 = inlined_call_operand.vmem [shape: f32[12,1], index: 3, kind: input, shape index: {}]   ;;  %s230_s4 = inlined_call_operand.vmem [shape: f32[12,1], index: 4, kind: input, shape index: {}]   ;;  %s231_s5 = inlined_call_operand.<no memory space> [shape: f32[1,1], index: 5, kind: input, shape index: {}]   ;;  %s232_s6 = inlined_call_operand.hbm [shape: f32[1,128], index: 6, kind: output, shape index: {}]  }
   0x1   :  { %v11_v0 = vstv %s231_s5 }
   0x2   :  { %12 = vst [vmem:[#allocation2] sm:$0x1] %v11_v0 }
   0x3   :  { %v28_v1 = vld [vmem:[%s227_s1 + $0x8] sm:$0xf]  ;;  %v27_v2 = vld [vmem:[%s227_s1] sm:$0xff]  ;;  %v156_v3 = vmov 0  }
   0x4   :  { %133 = vset.pattern.permute.xlu1 %v156_v3  ;;  %132 = vset.pattern.permute.xlu0 %v156_v3  ;;  %v46_v4 = vld [vmem:[%s228_s2 + $0x8] sm:$0xf]  ;;  %v45_v5 = vld [vmem:[%s228_s2] sm:$0xff] }
   0x5   :  { %36 = vperm.xlu0 %132, %v28_v1   ;;  %31 = vperm.xlu1 %133, %v27_v2  }
   0x6   :  { %13 = vsyncpa [#allocation4], 0  ;;  %v66_v6 = vld [vmem:[%s229_s3 + $0x8] sm:$0xf]  ;;  %v65_v7 = vld [vmem:[%s229_s3] sm:$0xff]  ;;  %v39_v11 = vlaneseq  ;;  %vm95_vm0 = vcmask 1043456  }
   0x7   :  { %v82_v8 = vld [vmem:[%s230_s4 + $0x8] sm:$0xf]  ;;  %v81_v9 = vld [vmem:[%s230_s4] sm:$0xff] }
   0x8   :  { %v40_v12 = vshrl.u32 %v39_v11, 7  ;;  %v26_v15 = vld [vmem:[%s226_s0] sm:$0x3]  ;;  %s157_s0 = smov [#allocation3]  }
   0x9   :  { %54 = vperm.xlu0 %132, %v46_v4   ;;  %49 = vperm.xlu1 %133, %v45_v5   ;;  %v104_v10 = vld [vmem:[#allocation2] sm:$0x1]  ;;  %s122_s4 = sshll.u32 %s157_s0, 4  ;;  %s123_s4 = int_to_ptr.vmem [resolvable:$true] %s122_s4 }
   0xa   :  { %v41_v13 = vsub.s32 0, %v40_v12  ;;  %v59_v14 = vsub.s32 1, %v40_v12  ;;  %s134_s13 = scalar_lea.vmem %s123_s4, 16  ;;  %s138_s14 = scalar_lea.vmem %s123_s4, 32 }
   0xb   :  { %p135_p0 = scmp.ne.s32.totalorder %s123_s4, %s134_s13  ;;  %p139_p1 = scmp.lt.s32.totalorder %s123_s4, %s123_s4 }
   0xc   :  { %v42_v18 = vrot.slane %v26_v15, %v41_v13  ;;  %v60_v19 = vrot.slane %v26_v15, %v59_v14  ;;  %p140_p2 = scmp.lt.s32.totalorder %s138_s14, %s134_s13 }
   0xd   :  { %74 = vperm.xlu0 %132, %v66_v6   ;;  %69 = vperm.xlu1 %133, %v65_v7  }
   0xe   :  { %p141_p3 = por %p140_p2, %p139_p1 }
  0x10   :  { %p142_p4 = pnand %p141_p3, %p135_p0 }
  0x11   :  { %90 = vperm.xlu0 %132, %v82_v8   ;;  %85 = vperm.xlu1 %133, %v81_v9  }
  0x15   :  { %107 = vperm.xlu0 %132, %v104_v10  }
  0x80   :  { %v37_v16 = vpop.permute.xlu0 %36  ;;  %v32_v17 = vpop.permute.xlu1 %31 }
  0x81   :  { %v44_v22 = vmul.f32 %v42_v18, %v37_v16  ;;  %v43_v23 = vmul.f32 %v42_v18, %v32_v17 }
  0x84   :  { %v55_v20 = vpop.permute.xlu0 %54  ;;  %v50_v21 = vpop.permute.xlu1 %49 }
  0x85   :  { %v62_v24 = vmul.f32 %v60_v19, %v55_v20  ;;  %v61_v25 = vmul.f32 %v60_v19, %v50_v21 }
  0x87   :  { %v64_v26 = vadd.f32 %v62_v24, %v44_v22  ;;  %v63_v27 = vadd.f32 %v61_v25, %v43_v23 }
  0x88   :  { %v75_v28 = vpop.permute.xlu0 %74  ;;  %v70_v29 = vpop.permute.xlu1 %69 }
  0x89   :  { %v78_v30 = vadd.f32 %v75_v28, %v64_v26  ;;  %v77_v31 = vadd.f32 %v70_v29, %v63_v27 }
  0x8b   :  { %v80_v32 = vmax.f32 %v78_v30, 0.0  ;;  %v79_v33 = vmax.f32 %v77_v31, 0.0 }
  0x8c   :  { %v91_v34 = vpop.permute.xlu0 %90  ;;  %v86_v35 = vpop.permute.xlu1 %85 }
  0x8d   :  { %v94_v36 = vmul.f32 %v91_v34, %v80_v32  ;;  %v93_v37 = vmul.f32 %v86_v35, %v79_v33 }
  0x8f   :  { %v96_v38 = vsel %vm95_vm0, %v94_v36, 0.0 }
  0x90   :  { %v97_v39 = vadd.f32 %v96_v38, %v93_v37  ;;  %v108_v44 = vpop.permute.xlu0 %107 }
  0x91   :  { %v113_v46 = vrot.slane %v108_v44, %v41_v13 }
  0x92   :  { %v98_v40 = vrot.slane %v97_v39, 4 }
  0x94   :  { %v99_v41 = vadd.f32 %v98_v40, %v97_v39 }
  0x96   :  { %v100_v42 = vrot.slane %v99_v41, 2 }
  0x98   :  { %v101_v43 = vadd.f32 %v100_v42, %v99_v41 }
  0x9a   :  { %v102_v45 = vrot.slane %v101_v43, 1 }
  0x9c   :  { %v103_v47 = vadd.f32 %v102_v45, %v101_v43 }
  0x9e   :  { %v114_v48 = vadd.f32 %v113_v46, %v103_v47 }
  0xa0   :  { %115 = vst [vmem:[#allocation3] sm:$0x1] %v114_v48 }
  0xa1   :  { %145 = shalt.err (!%p142_p4)
}
  0xa2   :  { %125 = dma.vmem_to_hbm [thread:$0]  %s123_s4, 16, %s232_s6, [#allocation4]  }
  0xa3   :  { %154 = dma.done.wait [#allocation4], 16  }
  0xa4   :  { %155 = vsyncadd [#allocation4], 4294967280 }
  0xa5   :  { %129 = vsyncpa [#allocation4], 1 }

</bundles_post_ra>
